<compile_context>
chip_gen: v6e
topology: v6e:2x2x1
jax: 0.10.0
libtpu: 0.0.40
codegen_flags: <defaults>
</compile_context>

<pallas_src>
import jax
import jax.numpy as jnp
from jax.experimental import pallas as pl
from jax.experimental.pallas import tpu as pltpu

BN_EPS = 1e-5


def _round_up(x, m):
    return (x + m - 1) // m * m


def grcl_unit_kernel(p_ref, wgf_ref, wgr_ref, wf_ref, wr_ref, out_ref):
    # p_ref: (tr, 8) folded per-row (per image*channel) params:
    #   col 0: s0 (BN_gfu scale)   col 1: s1 (BN_grx scale)
    #   col 2: s2 (BN_fu  scale)   col 3: s3' = s3*s4
    #   col 4: b01 = b0+b1         col 5: b3' = b3*s4
    #   col 6: b24 = b2+b4         col 7: unused
    p = p_ref[...]
    s0, s1, s2 = p[:, 0:1], p[:, 1:2], p[:, 2:3]
    s3p = p[:, 3:4]
    b01, b3p, b24 = p[:, 4:5], p[:, 5:6], p[:, 6:7]

    wgf = wgf_ref[...].astype(jnp.float32)
    wgr = wgr_ref[...].astype(jnp.float32)
    wf = wf_ref[...].astype(jnp.float32)
    wr = wr_ref[...].astype(jnp.float32)

    G = jax.nn.sigmoid(wgf * s0 + wgr * s1 + b01)
    x = wf * s2 + (wr * s3p + b3p) * G + b24
    out_ref[...] = jnp.maximum(x, 0.0).astype(out_ref.dtype)


def _fold_params(scales, biases):
    """(5, C) BN scales/biases -> (C, 8) folded per-channel parameter pack."""
    s0, s1, s2, s3, s4 = (scales[i].astype(jnp.float32) for i in range(5))
    b0, b1, b2, b3, b4 = (biases[i].astype(jnp.float32) for i in range(5))
    cols = [s0, s1, s2, s3 * s4, b0 + b1, b3 * s4, b2 + b4, jnp.zeros_like(s0)]
    return jnp.stack(cols, axis=1)  # (C, 8)


def grcl_unit_pallas(wgf_u, wgr_x, wf_u, wr_x, scales, biases, *, tr=None):
    """wgf_u, wgr_x, wf_u, wr_x: (N, C, H, W); scales/biases: (5, C) folded BN
    (scale = gamma/sqrt(var+eps), bias = beta - mean*scale)."""
    N, C, H, W = wgf_u.shape
    R, L = N * C, H * W
    dtype = wgf_u.dtype
    itemsize = jnp.dtype(dtype).itemsize

    # Row tile: ~1 MiB per data buffer -> ~10 MiB double-buffered across the
    # 4 inputs + 1 output; multiple of 8 sublanes; clamped to the row count.
    if tr is None:
        tr = max(8, ((1 << 20) // (L * itemsize)) // 8 * 8)
    tr = min(_round_up(tr, 8), _round_up(R, 8))
    grid = (pl.cdiv(R, tr),)

    # Per-row folded params, tiled once per image so rows align with the data.
    params = jnp.tile(_fold_params(scales, biases), (N, 1))  # (R, 8) f32

    def view(x):  # NCHW -> (N*C, H*W): contiguous, free reshape (no transpose)
        return x.reshape(R, L)

    data_spec = pl.BlockSpec((tr, L), lambda i: (i, 0))
    param_spec = pl.BlockSpec((tr, 8), lambda i: (i, 0))

    out2d = pl.pallas_call(
        grcl_unit_kernel,
        out_shape=jax.ShapeDtypeStruct((R, L), dtype),
        grid_spec=pltpu.PrefetchScalarGridSpec(
            num_scalar_prefetch=0,
            grid=grid,
            in_specs=[param_spec, data_spec, data_spec, data_spec, data_spec],
            out_specs=data_spec,
        ),
        compiler_params=pltpu.CompilerParams(
            dimension_semantics=("parallel",),
            vmem_limit_bytes=32 * 1024 * 1024,
        ),
    )(params, view(wgf_u), view(wgr_x), view(wf_u), view(wr_x))

    return out2d.reshape(N, C, H, W)


def make_bn_params(key, C):
    """Deterministic synthetic BatchNorm2d params for the 5 BN layers,
    pre-folded to (scale, bias), each of shape (5, C)."""
    k_gamma, k_beta, k_mean, k_var = jax.random.split(key, 4)
    gamma = jax.random.uniform(k_gamma, (5, C), jnp.float32, 0.5, 1.5)
    beta = 0.1 * jax.random.normal(k_beta, (5, C), jnp.float32)
    running_mean = 0.1 * jax.random.normal(k_mean, (5, C), jnp.float32)
    running_var = jax.random.uniform(k_var, (5, C), jnp.float32, 0.5, 1.5)
    scale = gamma * jax.lax.rsqrt(running_var + BN_EPS)
    bias = beta - running_mean * scale
    return scale, bias


def grcl_unit_ref(wgf_u, wgr_x, wf_u, wr_x, scales, biases):
    """Plain-JAX reference (NCHW), inference-mode BN semantics, no folding."""
    def bn(x, i):
        s = scales[i][None, :, None, None]
        b = biases[i][None, :, None, None]
        return x * s + b

    G = jax.nn.sigmoid(bn(wgf_u, 0) + bn(wgr_x, 1))
    return jnp.maximum(bn(wf_u, 2) + bn(bn(wr_x, 3) * G, 4), 0.0)


if __name__ == "__main__":
    key = jax.random.PRNGKey(0)

    def run_case(N, C, H, W, tr, subkey):
        k1, k2, k3, k4, kp = jax.random.split(subkey, 5)
        wgf_u = jax.random.normal(k1, (N, C, H, W), jnp.float32)
        wgr_x = jax.random.normal(k2, (N, C, H, W), jnp.float32)
        wf_u = jax.random.normal(k3, (N, C, H, W), jnp.float32)
        wr_x = jax.random.normal(k4, (N, C, H, W), jnp.float32)
        scales, biases = make_bn_params(kp, C)

        out = grcl_unit_pallas(wgf_u, wgr_x, wf_u, wr_x, scales, biases, tr=tr)
        out = jax.block_until_ready(out)
        ref = grcl_unit_ref(wgf_u, wgr_x, wf_u, wr_x, scales, biases)

        assert out.shape == (N, C, H, W)
        assert jnp.allclose(out, ref, atol=1e-5, rtol=1e-5), (
            f"mismatch vs reference for shape {(N, C, H, W)}")

    k_a, k_b = jax.random.split(key)
    # Lane-dense case: slab (N*C, H*W) = (64, 256), 4 row tiles of 16.
    run_case(2, 32, 16, 16, 16, k_a)
    # Ragged case: slab (40, 63) -> non-128 lane extent + padded tail row tile.
    run_case(2, 20, 7, 9, 16, k_b)

    print("KERNEL_OK")
</pallas_src>

<mosaic_0001>
module attributes {stable_mosaic.version = 11 : i64} {
  func.func @grcl_unit_kernel(%arg0: i32, %arg1: memref<16x8xf32, #tpu.memory_space<vmem>>, %arg2: memref<16x256xf32, #tpu.memory_space<vmem>>, %arg3: memref<16x256xf32, #tpu.memory_space<vmem>>, %arg4: memref<16x256xf32, #tpu.memory_space<vmem>>, %arg5: memref<16x256xf32, #tpu.memory_space<vmem>>, %arg6: memref<16x256xf32, #tpu.memory_space<vmem>>) attributes {dimension_semantics = [#tpu.dimension_semantics<parallel>], iteration_bounds = array<i64: 4>, scalar_prefetch = 0 : i64, scratch_operands = 0 : i64, tpu.core_type = #tpu.core_type<tc>, window_params = [{transform_indices = @transform_0, window_bounds = array<i64: 16, 8>}, {transform_indices = @transform_1, window_bounds = array<i64: 16, 256>}, {transform_indices = @transform_2, window_bounds = array<i64: 16, 256>}, {transform_indices = @transform_3, window_bounds = array<i64: 16, 256>}, {transform_indices = @transform_4, window_bounds = array<i64: 16, 256>}, {transform_indices = @transform_5, window_bounds = array<i64: 16, 256>}]} {
    %c0 = arith.constant 0 : index
    %c0_0 = arith.constant 0 : index
    %0 = vector.load %arg1[%c0, %c0_0] : memref<16x8xf32, #tpu.memory_space<vmem>>, vector<16x8xf32>
    %1 = vector.extract_strided_slice %0 {offsets = [0, 0], sizes = [16, 1], strides = [1, 1]} : vector<16x8xf32> to vector<16x1xf32>
    %2 = vector.extract_strided_slice %0 {offsets = [0, 1], sizes = [16, 1], strides = [1, 1]} : vector<16x8xf32> to vector<16x1xf32>
    %3 = vector.extract_strided_slice %0 {offsets = [0, 2], sizes = [16, 1], strides = [1, 1]} : vector<16x8xf32> to vector<16x1xf32>
    %4 = vector.extract_strided_slice %0 {offsets = [0, 3], sizes = [16, 1], strides = [1, 1]} : vector<16x8xf32> to vector<16x1xf32>
    %5 = vector.extract_strided_slice %0 {offsets = [0, 4], sizes = [16, 1], strides = [1, 1]} : vector<16x8xf32> to vector<16x1xf32>
    %6 = vector.extract_strided_slice %0 {offsets = [0, 5], sizes = [16, 1], strides = [1, 1]} : vector<16x8xf32> to vector<16x1xf32>
    %7 = vector.extract_strided_slice %0 {offsets = [0, 6], sizes = [16, 1], strides = [1, 1]} : vector<16x8xf32> to vector<16x1xf32>
    %c0_1 = arith.constant 0 : index
    %c0_2 = arith.constant 0 : index
    %8 = vector.load %arg2[%c0_1, %c0_2] : memref<16x256xf32, #tpu.memory_space<vmem>>, vector<16x256xf32>
    %c0_3 = arith.constant 0 : index
    %c0_4 = arith.constant 0 : index
    %9 = vector.load %arg3[%c0_3, %c0_4] : memref<16x256xf32, #tpu.memory_space<vmem>>, vector<16x256xf32>
    %c0_5 = arith.constant 0 : index
    %c0_6 = arith.constant 0 : index
    %10 = vector.load %arg4[%c0_5, %c0_6] : memref<16x256xf32, #tpu.memory_space<vmem>>, vector<16x256xf32>
    %c0_7 = arith.constant 0 : index
    %c0_8 = arith.constant 0 : index
    %11 = vector.load %arg5[%c0_7, %c0_8] : memref<16x256xf32, #tpu.memory_space<vmem>>, vector<16x256xf32>
    %12 = vector.broadcast %1 : vector<16x1xf32> to vector<16x256xf32>
    %13 = arith.mulf %8, %12 : vector<16x256xf32>
    %14 = vector.broadcast %2 : vector<16x1xf32> to vector<16x256xf32>
    %15 = arith.mulf %9, %14 : vector<16x256xf32>
    %16 = arith.addf %13, %15 : vector<16x256xf32>
    %17 = vector.broadcast %5 : vector<16x1xf32> to vector<16x256xf32>
    %18 = arith.addf %16, %17 : vector<16x256xf32>
    %19 = arith.negf %18 : vector<16x256xf32>
    %20 = math.exp %19 : vector<16x256xf32>
    %cst = arith.constant 1.000000e+00 : f32
    %21 = vector.broadcast %cst : f32 to vector<16x256xf32>
    %22 = arith.addf %21, %20 : vector<16x256xf32>
    %23 = arith.divf %21, %22 : vector<16x256xf32>
    %24 = vector.broadcast %3 : vector<16x1xf32> to vector<16x256xf32>
    %25 = arith.mulf %10, %24 : vector<16x256xf32>
    %26 = vector.broadcast %4 : vector<16x1xf32> to vector<16x256xf32>
    %27 = arith.mulf %11, %26 : vector<16x256xf32>
    %28 = vector.broadcast %6 : vector<16x1xf32> to vector<16x256xf32>
    %29 = arith.addf %27, %28 : vector<16x256xf32>
    %30 = arith.mulf %29, %23 : vector<16x256xf32>
    %31 = arith.addf %25, %30 : vector<16x256xf32>
    %32 = vector.broadcast %7 : vector<16x1xf32> to vector<16x256xf32>
    %33 = arith.addf %31, %32 : vector<16x256xf32>
    %cst_9 = arith.constant 0.000000e+00 : f32
    %34 = vector.broadcast %cst_9 : f32 to vector<16x256xf32>
    %35 = arith.maximumf %33, %34 : vector<16x256xf32>
    %c0_10 = arith.constant 0 : index
    %c0_11 = arith.constant 0 : index
    %36 = vector.load %arg6[%c0_10, %c0_11] : memref<16x256xf32, #tpu.memory_space<vmem>>, vector<16x256xf32>
    tpu.vector_store %arg6[%c0_10, %c0_11], %35 {strides = array<i32>} : memref<16x256xf32, #tpu.memory_space<vmem>>, vector<16x256xf32>,
    return
  }
  func.func @transform_0(%arg0: i32) -> (i32, i32) {
    %c0_i32 = arith.constant 0 : i32
    %c0_i32_0 = arith.constant 0 : i32
    return %arg0, %c0_i32 : i32, i32
  }
  func.func @transform_1(%arg0: i32) -> (i32, i32) {
    %c0_i32 = arith.constant 0 : i32
    %c0_i32_0 = arith.constant 0 : i32
    return %arg0, %c0_i32 : i32, i32
  }
  func.func @transform_2(%arg0: i32) -> (i32, i32) {
    %c0_i32 = arith.constant 0 : i32
    %c0_i32_0 = arith.constant 0 : i32
    return %arg0, %c0_i32 : i32, i32
  }
  func.func @transform_3(%arg0: i32) -> (i32, i32) {
    %c0_i32 = arith.constant 0 : i32
    %c0_i32_0 = arith.constant 0 : i32
    return %arg0, %c0_i32 : i32, i32
  }
  func.func @transform_4(%arg0: i32) -> (i32, i32) {
    %c0_i32 = arith.constant 0 : i32
    %c0_i32_0 = arith.constant 0 : i32
    return %arg0, %c0_i32 : i32, i32
  }
  func.func @transform_5(%arg0: i32) -> (i32, i32) {
    %c0_i32 = arith.constant 0 : i32
    %c0_i32_0 = arith.constant 0 : i32
    return %arg0, %c0_i32 : i32, i32
  }
}

</mosaic_0001>

<bundles_post_ra>
// kernel: tpu_custom_call.1
= control target key start
LH: loop header
LB: loop body
LE: loop exit
PB: predicated region body
PF: predicated region fallthrough
CT: control target
= control target key end

     0   :  { %s1396_s0 = inlined_call_operand.vmem [shape: f32[64,8], index: 0, kind: input, shape index: {}]   ;;  %s1397_s1 = inlined_call_operand.hbm [shape: f32[64,256], index: 1, kind: input, shape index: {}]   ;;  %s1398_s2 = inlined_call_operand.hbm [shape: f32[64,256], index: 2, kind: input, shape index: {}]   ;;  %s1399_s3 = inlined_call_operand.hbm [shape: f32[64,256], index: 3, kind: input, shape index: {}]   ;;  %s1400_s4 = inlined_call_operand.hbm [shape: f32[64,256], index: 4, kind: input, shape index: {}]   ;;  %s1401_s5 = inlined_call_operand.hbm [shape: f32[64,256], index: 5, kind: output, shape index: {}]  }
   0x1   :  { %1412 = sst [smem:[#allocation19_spill]] %s1397_s1 }
   0x2   :  { %1413 = sst [smem:[#allocation20_spill]] %s1398_s2 }
   0x3   :  { %10 = vsyncpa [#allocation3], 0 }
   0x4   :  { %12 = vsyncpa [#allocation3 + $0x1], 0 }
   0x5   :  { %13 = vsyncpa [#allocation6], 0 }
   0x6   :  { %15 = vsyncpa [#allocation6 + $0x1], 0 }
   0x7   :  { %16 = vsyncpa [#allocation9], 0 }
   0x8   :  { %18 = vsyncpa [#allocation9 + $0x1], 0 }
   0x9   :  { %19 = vsyncpa [#allocation4], 0 }
   0xa   :  { %21 = vsyncpa [#allocation4 + $0x1], 0  ;;  %s1083_s18 = smov 0   ;;  %s1085_s19 = smov 0  }
   0xb   :  { %s1087_s20 = smov 0   ;;  %s1089_s21 = smov 0  }
   0xc LB: > { %1414 = sst [smem:[#allocation15_spill]] %s1031_s20  ;;  %s1104_s22 = sadd.s32 4294967295, %s1035_s21   ;;  %s1035_s21 = sphi %s1089_s21, %s1434_s21   ;;  %s1031_s20 = sphi %s1087_s20, %s1436_s20   ;;  %s1027_s19 = sphi %s1085_s19, %s1438_s19   ;;  %s1023_s18 = sphi %s1083_s18, %s1437_s18  }
   0xd   : > { %s705_s23 = sadd.s32 4294967294, %s1035_s21   ;;  %s1108_s24 = sadd.s32 1, %s1035_s21  }
   0xe   : > { %1415 = sst [smem:[#allocation16_spill]] %s1108_s24  ;;  %s60_s25 = sadd.s32 1, %s1031_s20 }
   0xf   : > { %s57_s26 = ssub.s32 %s1035_s21, %s1108_s24  ;;  %p67_p0 = scmp.ne.s32.totalorder %s1031_s20, %s1027_s19 }
  0x10   : > { %p58_p1 = scmp.eq.s32.totalorder %s57_s26, 0  ;;  %p68_p2 = scmp.eq.s32.totalorder %s1035_s21, 0 }
  0x11   : > { %p73_p3 = scmp.ne.s32.totalorder %s1027_s19, %s1023_s18  ;;  %p74_p4 = scmp.eq.s32.totalorder %s1104_s22, 0 }
  0x12   : > { %s1120_s27 = scalar_select %p58_p1, %s1031_s20, %s60_s25  }
  0x13   : > { %p69_p5 = por %p68_p2, %p67_p0  ;;  %p1122_p6 = por %p74_p4, %p73_p3 }
  0x14   : > { %1416 = sst [smem:[#allocation17_spill]] %s1120_s27  ;;  %p175_p7 = scmp.eq.s32.totalorder %s1104_s22, 3 }
  0x15   : > { %s1417_s28 = scalar_select %p1122_p6, 1, 0 }
  0x16   : > { %p181_p8 = scmp.eq.s32.totalorder %s705_s23, 3  ;;  %p779_p9 = scmp.lt.s32.totalorder %s1035_s21, 4 }
  0x17   : > { %p1128_p10 = por %p175_p7, %p67_p0  ;;  %s1137_s6 = sand.u32 1, %s1031_s20  }
  0x18   : > { %p1132_p11 = por %p181_p8, %p73_p3  ;;  %s1140_s7 = sshll.u32 %s1035_s21, 9 }
  0x19   : > { %s1418_s29 = scalar_select %p1128_p10, 1, 0 }
  0x1a   : > { %s1419_s30 = scalar_select %p1132_p11, 1, 0 }
  0x1b   : > { %s1143_s8 = sshll.u32 %s1137_s6, 5  ;;  %p1145_p12 = pnand %p779_p9, %p69_p5 }
  0x1c   : > { %1420 = sst [smem:[#allocation18_spill]] %s1419_s30  ;;  %s232_s10 = sand.u32 1, %s1035_s21  }
  0x1d   : > { %s1422_s2 = sld [smem:[#allocation20_spill]]  ;;  %s236_s14 = scalar_lea.vmem [#allocation5], %s1143_s8 }
  0x1e   : > { %s244_s15 = sshll.u32 %s236_s14, 4  ;;  %s1160_s16 = scalar_lea.sflag [#allocation6], %s232_s10  ;;  %s1157_s15 = int_to_ptr.vmem [resolvable:$true] %s244_s15 }
  0x1f   : > { %p1166_p1 = pneg %p1145_p12 }
  0x23   : > { %s1154_s13 = scalar_lea.hbm %s1422_s2, %s1140_s7  ;;  %s856_s11 = scalar_lea.hbm %s1422_s2, 2048 }
  0x24   : > { %s851_s17 = scalar_lea.hbm %s1154_s13, 512  ;;  %p857_p4 = scmp.lt.s32.totalorder %s1154_s13, %s1422_s2 }
  0x25   : > { %p852_p0 = scmp.ne.s32.totalorder %s1154_s13, %s851_s17  ;;  %p858_p5 = scmp.lt.s32.totalorder %s856_s11, %s851_s17 }
  0x27   : > { %p854_p2 = pnand %p1166_p1, %p852_p0  ;;  %p859_p7 = por %p858_p5, %p857_p4 }
  0x29   : > { %p855_p3 = pneg %p854_p2 }
  0x2b   : > { %p860_p8 = pnand %p859_p7, %p855_p3 }
  0x2d   : > { %863 = shalt.err (!%p860_p8)
}
  0x2e   : > { %s864_s10 = scalar_lea.vmem %s1157_s15, 512  ;;  %s1037_s27 = smov [#allocation5]  }
  0x2f   : > { %p865_p9 = scmp.ne.s32.totalorder %s1157_s15, %s864_s10  ;;  %s869_s25 = sshll.u32 %s1037_s27, 4  ;;  %s870_s25 = int_to_ptr.vmem [resolvable:$false] %s869_s25 }
  0x30   : > { %s871_s26 = scalar_lea.vmem %s870_s25, 1024  ;;  %p872_p13 = scmp.lt.s32.totalorder %s1157_s15, %s870_s25 }
  0x31   : > { %p867_p0 = pnand %p865_p9, %p1166_p1  ;;  %p873_p11 = scmp.lt.s32.totalorder %s871_s26, %s864_s10 }
  0x33   : > { %p868_p2 = pneg %p867_p0  ;;  %p874_p10 = por %p873_p11, %p872_p13 }
  0x35   : > { %p875_p6 = pnand %p874_p10, %p868_p2 }
  0x37   : > { %878 = shalt.err (!%p875_p6)
}
  0x38   : > { %s1404_s17 = smov 256   ;;  %s1406_s11 = smov 16  }
  0x39   : > { %768 = dma.hbm_to_vmem [thread:$0]  (!%p1145_p12), %s1154_s13, 512, %s1157_s15, %s1160_s16, %s1404_s17, %s1404_s17, %s1406_s11  }
  0x3a   : > { %p296_p11 = scmp.lt.s32.totalorder %s1035_s21, 5  ;;  %s1424_s1 = sld [smem:[#allocation19_spill]] }
  0x3b   : > { %p1425_p6 = scmp.ge.s32.totalorder %s1035_s21, 1  ;;  %s214_s25 = scalar_lea.vmem [#allocation2], %s1143_s8 }
  0x3c   : > { %s222_s26 = sshll.u32 %s214_s25, 4  ;;  %s211_s2 = scalar_lea.sflag [#allocation3], %s1137_s6  ;;  %s1206_s26 = int_to_ptr.vmem [resolvable:$true] %s222_s26 }
  0x3d   : > { %p1201_p10 = pnand %p1425_p6, %p296_p11 }
  0x3f   : > { %s1426_s10 = scalar_select %p1201_p10, 1, 0 }
  0x40   : > { %s1197_s14 = scalar_lea.hbm %s1424_s1, %s1140_s7  ;;  %s884_s12 = scalar_lea.hbm %s1424_s1, 2048 }
  0x41   : > { %s879_s13 = scalar_lea.hbm %s1197_s14, 512  ;;  %p885_p5 = scmp.lt.s32.totalorder %s1197_s14, %s1424_s1 }
  0x42   : > { %p880_p13 = scmp.ne.s32.totalorder %s1197_s14, %s879_s13  ;;  %p886_p7 = scmp.lt.s32.totalorder %s884_s12, %s879_s13 }
  0x44   : > { %p882_p3 = pnand %p880_p13, %p1166_p1  ;;  %p887_p8 = por %p886_p7, %p885_p5 }
  0x46   : > { %p883_p4 = pneg %p882_p3 }
  0x48   : > { %p888_p9 = pnand %p887_p8, %p883_p4 }
  0x4a   : > { %891 = shalt.err (!%p888_p9)
}
  0x4b   : > { %s892_s25 = scalar_lea.vmem %s1206_s26, 512  ;;  %s1040_s20 = smov [#allocation2]  }
  0x4c   : > { %p893_p0 = scmp.ne.s32.totalorder %s1206_s26, %s892_s25  ;;  %s897_s15 = sshll.u32 %s1040_s20, 4  ;;  %s898_s15 = int_to_ptr.vmem [resolvable:$false] %s897_s15 }
  0x4d   : > { %s899_s27 = scalar_lea.vmem %s898_s15, 1024  ;;  %p900_p6 = scmp.lt.s32.totalorder %s1206_s26, %s898_s15 }
  0x4e   : > { %p895_p2 = pnand %p893_p0, %p1166_p1  ;;  %p901_p13 = scmp.lt.s32.totalorder %s899_s27, %s892_s25 }
  0x50   : > { %p896_p11 = pneg %p895_p2  ;;  %p902_p3 = por %p901_p13, %p900_p6 }
  0x52   : > { %p903_p10 = pnand %p902_p3, %p896_p11 }
  0x54   : > { %906 = shalt.err (!%p903_p10)
}
  0x55   : > { %s1427_s17 = smov 16   ;;  %s1428_s11 = smov 256  }
  0x56   : > { %765 = dma.hbm_to_vmem [thread:$0]  (!%p1145_p12), %s1197_s14, 512, %s1206_s26, %s211_s2, %s1428_s11, %s1428_s11, %s1427_s17  }
  0x57   : > { %s1236_s12 = scalar_lea.hbm %s1399_s3, %s1140_s7  ;;  %s258_s25 = scalar_lea.vmem [#allocation7], %s1143_s8 }
  0x58   : > { %s266_s15 = sshll.u32 %s258_s25, 4  ;;  %s907_s27 = scalar_lea.hbm %s1236_s12, 512  ;;  %s267_s15 = int_to_ptr.vmem [resolvable:$true] %s266_s15 }
  0x59   : > { %p908_p10 = scmp.ne.s32.totalorder %s1236_s12, %s907_s27  ;;  %s912_s2 = scalar_lea.hbm %s1399_s3, 2048 }
  0x5a   : > { %p913_p7 = scmp.lt.s32.totalorder %s1236_s12, %s1399_s3  ;;  %p914_p8 = scmp.lt.s32.totalorder %s912_s2, %s907_s27 }
  0x5b   : > { %p910_p4 = pnand %p908_p10, %p1166_p1 }
  0x5c   : > { %p915_p9 = por %p914_p8, %p913_p7 }
  0x5d   : > { %p911_p5 = pneg %p910_p4 }
  0x5f   : > { %p916_p0 = pnand %p915_p9, %p911_p5 }
  0x61   : > { %919 = shalt.err (!%p916_p0)
}
  0x62   : > { %s920_s13 = scalar_lea.vmem %s267_s15, 512  ;;  %s1041_s20 = smov [#allocation7]  }
  0x63   : > { %p921_p2 = scmp.ne.s32.totalorder %s267_s15, %s920_s13  ;;  %s925_s25 = sshll.u32 %s1041_s20, 4  ;;  %s926_s25 = int_to_ptr.vmem [resolvable:$false] %s925_s25 }
  0x64   : > { %s927_s30 = scalar_lea.vmem %s926_s25, 1024  ;;  %p928_p13 = scmp.lt.s32.totalorder %s267_s15, %s926_s25 }
  0x65   : > { %p923_p11 = pnand %p921_p2, %p1166_p1  ;;  %p929_p3 = scmp.lt.s32.totalorder %s927_s30, %s920_s13 }
  0x67   : > { %p924_p6 = pneg %p923_p11  ;;  %p930_p10 = por %p929_p3, %p928_p13 }
  0x69   : > { %p931_p4 = pnand %p930_p10, %p924_p6 }
  0x6b   : > { %934 = shalt.err (!%p931_p4)
}
  0x6c   : > { %771 = dma.hbm_to_vmem [thread:$0]  (!%p1145_p12), %s1236_s12, 512, %s267_s15, %s1160_s16, %s1428_s11, %s1428_s11, %s1427_s17  }
  0x6d   : > { %s1263_s27 = scalar_lea.hbm %s1400_s4, %s1140_s7  ;;  %s280_s30 = scalar_lea.vmem [#allocation8], %s1143_s8 }
  0x6e   : > { %s288_s2 = sshll.u32 %s280_s30, 4  ;;  %s277_s14 = scalar_lea.sflag [#allocation9], %s1137_s6  ;;  %s1266_s2 = int_to_ptr.vmem [resolvable:$true] %s288_s2 }
  0x6f   : > { %s935_s26 = scalar_lea.hbm %s1263_s27, 512  ;;  %s940_s12 = scalar_lea.hbm %s1400_s4, 2048 }
  0x70   : > { %p936_p5 = scmp.ne.s32.totalorder %s1263_s27, %s935_s26  ;;  %p941_p9 = scmp.lt.s32.totalorder %s1263_s27, %s1400_s4 }
  0x71   : > { %p942_p0 = scmp.lt.s32.totalorder %s940_s12, %s935_s26 }
  0x72   : > { %p938_p7 = pnand %p936_p5, %p1166_p1 }
  0x73   : > { %p943_p2 = por %p942_p0, %p941_p9 }
  0x74   : > { %p939_p8 = pneg %p938_p7 }
  0x76   : > { %p944_p11 = pnand %p943_p2, %p939_p8 }
  0x78   : > { %947 = shalt.err (!%p944_p11)
}
  0x79   : > { %s948_s6 = scalar_lea.vmem %s1266_s2, 512  ;;  %s1042_s8 = smov [#allocation8]  }
  0x7a   : > { %p949_p6 = scmp.ne.s32.totalorder %s1266_s2, %s948_s6  ;;  %s953_s20 = sshll.u32 %s1042_s8, 4  ;;  %s954_s20 = int_to_ptr.vmem [resolvable:$false] %s953_s20 }
  0x7b   : > { %s955_s25 = scalar_lea.vmem %s954_s20, 1024  ;;  %p956_p10 = scmp.lt.s32.totalorder %s1266_s2, %s954_s20 }
  0x7c   : > { %p951_p13 = pnand %p949_p6, %p1166_p1  ;;  %p957_p4 = scmp.lt.s32.totalorder %s955_s25, %s948_s6 }
  0x7e   : > { %p952_p3 = pneg %p951_p13  ;;  %p958_p5 = por %p957_p4, %p956_p10 }
  0x80   : > { %p959_p7 = pnand %p958_p5, %p952_p3 }
  0x82   : > { %962 = shalt.err (!%p959_p7)
}
  0x83   : > { %774 = dma.hbm_to_vmem [thread:$0]  (!%p1145_p12), %s1263_s27, 512, %s1266_s2, %s277_s14, %s1428_s11, %s1428_s11, %s1427_s17  }
  0x84   : > { %p1429_p1 = scmp.ne.s32.totalorder %s1426_s10, 0 }
  0x85   : > { %s1295_s23 = sand.u32 (!%p1429_p1), 1, %s1027_s19   ;;  %p1430_p8 = scmp.ne.s32.totalorder (!%p1429_p1), %s1417_s28, 0 }
  0x86   : > { %300 = sbr.rel (%p1429_p1) target bundleno = 345 (0x159), region = 40  ;;  %s1298_s1 = sshll.u32 (!%p1429_p1), %s1295_s23, 5 }
  0x87   : > { %s303_s24 = scalar_lea.sflag (!%p1429_p1), [#allocation3], %s1295_s23  ;;  %s1302_s9 = scalar_lea.vmem (!%p1429_p1), [#allocation2], %s1298_s1 }
  0x8b   : > { %1006 = dma.done.wait (%p1430_p8), %s303_s24, 512  }
  0x8c   : > { %1008 = vsyncadd (%p1430_p8), %s303_s24, 4294966784  ;;  %s311_s10 = sand.u32 1, %s1104_s22   ;;  %s1310_s11 = scalar_lea.vmem [#allocation5], %s1298_s1 }
  0x8d   : > { %s312_s17 = scalar_lea.sflag [#allocation6], %s311_s10 }
  0x8e   : > { %1010 = dma.done.wait (%p1430_p8), %s312_s17, 1024  }
  0x8f   : > { %1012 = vsyncadd (%p1430_p8), %s312_s17, 4294966272  ;;  %s1317_s27 = scalar_lea.vmem [#allocation7], %s1298_s1  ;;  %s330_s30 = scalar_lea.sflag [#allocation9], %s1295_s23 }
  0x90   : > { %s1321_s2 = scalar_lea.vmem [#allocation8], %s1298_s1 }
  0x91   : > { %1014 = dma.done.wait (%p1430_p8), %s330_s30, 512  }
  0x92   : > { %1016 = vsyncadd (%p1430_p8), %s330_s30, 4294966784  ;;  %s730_s14 = sshll.u32 %s1104_s22, 1  ;;  %v1043_v0 = vmov 1   ;;  %v1044_v1 = vmov 0   ;;  %v1045_v4 = vmov 4   ;;  %v1046_v5 = vmov 3  }
  0x93   : > { %825 = vset.pattern.permute.xlu1 %v1043_v0  ;;  %824 = vset.pattern.permute.xlu0 %v1044_v1  ;;  %p381_p12 = scmp.lt.s32.totalorder %s730_s14, 7  ;;  %v1047_v6 = vmov 5   ;;  %v1048_v7 = vmov 2   ;;  %v1049_v8 = vmov 6   ;;  %v397_v9 = vld [vmem:[%s1310_s11] sm:$0xff]  ;;  %v398_v10 = vld [vmem:[%s1310_s11 + $0x8] sm:$0xff] }
  0x94   : > { %v393_v13 = vld [vmem:[%s1302_s9] sm:$0xff]  ;;  %v394_v14 = vld [vmem:[%s1302_s9 + $0x8] sm:$0xff]  ;;  %v399_v15 = vld [vmem:[%s1310_s11 + $0x10] sm:$0xff]  ;;  %s379_s28 = scalar_lea.vmem [#allocation10], %s1298_s1  ;;  %s751_s7 = sshll.u32 %s1104_s22, 9 }
  0x95   : > { %s1440_s14 = smov (!%p381_p12, %s730_s14), 7  ;;  %v400_v16 = vld [vmem:[%s1310_s11 + $0x18] sm:$0xff]  ;;  %v395_v17 = vld [vmem:[%s1302_s9 + $0x10] sm:$0xff]  ;;  %v405_v57 = vld [vmem:[%s1321_s2] sm:$0xff]  ;;  %s554_s15 = sshll.u32 %s379_s28, 4  ;;  %s1349_s15 = int_to_ptr.vmem [resolvable:$true] %s554_s15 }
  0x96   : > { %s731_s26 = sshll.u32 %s1440_s14, 3  ;;  %v396_v18 = vld [vmem:[%s1302_s9 + $0x18] sm:$0xff]  ;;  %v407_v53 = vld [vmem:[%s1321_s2 + $0x10] sm:$0xff]  ;;  %v406_v58 = vld [vmem:[%s1321_s2 + $0x8] sm:$0xff]  ;;  %s1354_s20 = scalar_lea.hbm %s1401_s5, %s751_s7 }
  0x97   : > { %s384_s12 = scalar_lea.vmem %s1396_s0, %s731_s26  ;;  %v408_v56 = vld [vmem:[%s1321_s2 + $0x18] sm:$0xff]  ;;  %v403_v61 = vld [vmem:[%s1317_s27 + $0x10] sm:$0xff]  ;;  %s540_s22 = scalar_lea.sflag [#allocation4], %s1295_s23 }
  0x98   : > { %v391_v2 = vld [vmem:[%s384_s12] sm:$0xff]  ;;  %v392_v3 = vld [vmem:[%s384_s12 + $0x8] sm:$0xff]  ;;  %v404_v1 = vld [vmem:[%s1317_s27 + $0x18] sm:$0xff]  ;;  %s963_s25 = scalar_lea.vmem %s1349_s15, 512  ;;  %p1431_p0 = scmp.ne.s32.totalorder %s1418_s29, 0 }
  0x99   : > { %424 = vperm.xlu1 %825, %v391_v2   ;;  %411 = vperm.xlu0 %824, %v391_v2   ;;  %p964_p9 = scmp.ne.s32.totalorder %s1349_s15, %s963_s25  ;;  %s1050_s1 = smov [#allocation10]  }
  0x9a   : > { %s967_s24 = sshll.u32 %s1050_s1, 4  ;;  %s968_s24 = int_to_ptr.vmem [resolvable:$false] %s967_s24 }
  0x9b   : > { %p965_p2 = pnand %p964_p9, %p1431_p0  ;;  %s969_s9 = scalar_lea.vmem %s968_s24, 1024 }
  0x9c   : > { %p970_p6 = scmp.lt.s32.totalorder %s1349_s15, %s968_s24  ;;  %p971_p13 = scmp.lt.s32.totalorder %s969_s9, %s963_s25 }
  0x9d   : > { %428 = vperm.xlu1 %825, %v392_v3   ;;  %416 = vperm.xlu0 %824, %v392_v3   ;;  %p966_p11 = pneg %p965_p2 }
  0x9e   : > { %p972_p3 = por %p971_p13, %p970_p6 }
  0xa0   : > { %p973_p10 = pnand %p972_p3, %p966_p11 }
  0xa1   : > { %827 = vset.pattern.permute.xlu1 %v1045_v4  ;;  %826 = vset.pattern.permute.xlu0 %v1045_v4 }
  0xa2   : > { %444 = vperm.xlu1 %827, %v392_v3   ;;  %440 = vperm.xlu0 %826, %v391_v2  }
  0xa6   : > { %828 = vset.pattern.permute.xlu1 %v1046_v5  ;;  %829 = vset.pattern.permute.xlu0 %v1046_v5 }
  0xa7   : > { %488 = vperm.xlu1 %828, %v391_v2   ;;  %492 = vperm.xlu0 %829, %v392_v3  }
  0xab   : > { %830 = vset.pattern.permute.xlu1 %v1047_v6  ;;  %831 = vset.pattern.permute.xlu0 %v1048_v7  ;;  %v402_v6 = vld [vmem:[%s1317_s27 + $0x8] sm:$0xff] }
  0xac   : > { %500 = vperm.xlu1 %830, %v391_v2   ;;  %476 = vperm.xlu0 %831, %v391_v2  }
  0xb0   : > { %504 = vperm.xlu1 %830, %v392_v3   ;;  %834 = vset.pattern.permute.xlu0 %v1049_v8 }
  0xb1   : > { %524 = vperm.xlu0 %834, %v392_v3  }
  0xb4   : > { %832 = vset.pattern.permute.xlu1 %v1048_v7 }
  0xb5   : > { %480 = vperm.xlu1 %832, %v392_v3   ;;  %v401_v3 = vld [vmem:[%s1317_s27] sm:$0xff] }
  0xb9   : > { %833 = vset.pattern.permute.xlu1 %v1049_v8 }
  0xba   : > { %520 = vperm.xlu1 %833, %v391_v2  }
 0x114   : > { %v425_v11 = vpop.permute.xlu1 %424  ;;  %v412_v12 = vpop.permute.xlu0 %411 }
 0x115   : > { %v431_v19 = vmul.f32 %v425_v11, %v397_v9  ;;  %v432_v20 = vmul.f32 %v425_v11, %v398_v10  ;;  %v419_v21 = vmul.f32 %v412_v12, %v393_v13  ;;  %v420_v22 = vmul.f32 %v412_v12, %v394_v14 }
 0x117   : > { %v435_v31 = vadd.f32 %v431_v19, %v419_v21  ;;  %v436_v32 = vadd.f32 %v432_v20, %v420_v22 }
 0x118   : > { %v429_v23 = vpop.permute.xlu1 %428  ;;  %v417_v24 = vpop.permute.xlu0 %416 }
 0x119   : > { %v433_v25 = vmul.f32 %v429_v23, %v399_v15  ;;  %v434_v26 = vmul.f32 %v429_v23, %v400_v16  ;;  %v421_v27 = vmul.f32 %v417_v24, %v395_v17  ;;  %v422_v28 = vmul.f32 %v417_v24, %v396_v18 }
 0x11b   : > { %v437_v29 = vadd.f32 %v433_v25, %v421_v27  ;;  %v438_v30 = vadd.f32 %v434_v26, %v422_v28 }
 0x11d   : > { %v445_v33 = vpop.permute.xlu1 %444  ;;  %v441_v34 = vpop.permute.xlu0 %440 }
 0x11e   : > { %v449_v35 = vadd.f32 %v445_v33, %v437_v29  ;;  %v450_v36 = vadd.f32 %v445_v33, %v438_v30  ;;  %v447_v37 = vadd.f32 %v441_v34, %v435_v31  ;;  %v448_v38 = vadd.f32 %v441_v34, %v436_v32 }
 0x120   : > { %v734_v39 = vmul.f32 -1.442695, %v449_v35  ;;  %v735_v40 = vmul.f32 -1.442695, %v450_v36  ;;  %v732_v41 = vmul.f32 -1.442695, %v447_v37 }
 0x121   : > { %v733_v42 = vmul.f32 -1.442695, %v448_v38 }
 0x122   : > { %835 = vpow2.f32 %v734_v39  ;;  %v489_v43 = vpop.permute.xlu1 %488  ;;  %v493_v54 = vpop.permute.xlu0 %492 }
 0x123   : > { %837 = vpow2.f32 %v735_v40  ;;  %v497_v59 = vmul.f32 %v493_v54, %v407_v53  ;;  %v498_v60 = vmul.f32 %v493_v54, %v408_v56  ;;  %v495_v0 = vmul.f32 %v489_v43, %v405_v57 }
 0x124   : > { %839 = vpow2.f32 %v732_v41  ;;  %v496_v2 = vmul.f32 %v489_v43, %v406_v58 }
 0x125   : > { %841 = vpow2.f32 %v733_v42 }
 0x127   : > { %v501_v49 = vpop.permute.xlu1 %500  ;;  %v477_v63 = vpop.permute.xlu0 %476 }
 0x128   : > { %v507_v11 = vadd.f32 %v501_v49, %v495_v0  ;;  %v483_v13 = vmul.f32 %v477_v63, %v401_v3  ;;  %v508_v15 = vadd.f32 %v501_v49, %v496_v2  ;;  %v484_v17 = vmul.f32 %v477_v63, %v402_v6 }
 0x12b   : > { %v505_v55 = vpop.permute.xlu1 %504 }
 0x12c   : > { %v509_v4 = vadd.f32 %v505_v55, %v497_v59  ;;  %v510_v8 = vadd.f32 %v505_v55, %v498_v60  ;;  %v525_v18 = vpop.permute.xlu0 %524 }
 0x12f   : > { %v836_v44 = vpop.eup %835 }
 0x130   : > { %v838_v45 = vpop.eup %837  ;;  %v465_v46 = vadd.f32 1.0, %v836_v44  ;;  %v481_v62 = vpop.permute.xlu1 %480 }
 0x131   : > { %v840_v47 = vpop.eup %839  ;;  %v466_v48 = vadd.f32 1.0, %v838_v45  ;;  %v485_v5 = vmul.f32 %v481_v62, %v403_v61  ;;  %v486_v9 = vmul.f32 %v481_v62, %v404_v1 }
 0x132   : > { %v842_v50 = vpop.eup %841  ;;  %843 = vrcp.f32 %v465_v46  ;;  %v463_v51 = vadd.f32 1.0, %v840_v47 }
 0x133   : > { %845 = vrcp.f32 %v466_v48  ;;  %v464_v52 = vadd.f32 1.0, %v842_v50 }
 0x134   : > { %847 = vrcp.f32 %v463_v51 }
 0x135   : > { %849 = vrcp.f32 %v464_v52  ;;  %v521_v23 = vpop.permute.xlu1 %520 }
 0x13f   : > { %v844_v7 = vpop.eup %843 }
 0x140   : > { %v846_v10 = vpop.eup %845  ;;  %v513_v12 = vmul.f32 %v844_v7, %v509_v4 }
 0x141   : > { %v848_v14 = vpop.eup %847  ;;  %v514_v16 = vmul.f32 %v846_v10, %v510_v8 }
 0x142   : > { %v850_v19 = vpop.eup %849  ;;  %v511_v20 = vmul.f32 %v848_v14, %v507_v11  ;;  %v517_v21 = vadd.f32 %v513_v12, %v485_v5 }
 0x143   : > { %v512_v22 = vmul.f32 %v850_v19, %v508_v15  ;;  %v518_v24 = vadd.f32 %v514_v16, %v486_v9 }
 0x144   : > { %v515_v25 = vadd.f32 %v511_v20, %v483_v13  ;;  %v529_v26 = vadd.f32 %v525_v18, %v517_v21 }
 0x145   : > { %v516_v27 = vadd.f32 %v512_v22, %v484_v17  ;;  %v530_v28 = vadd.f32 %v525_v18, %v518_v24 }
 0x146   : > { %v527_v29 = vadd.f32 %v521_v23, %v515_v25  ;;  %v533_v30 = vmax.f32 %v529_v26, 0.0 }
 0x147   : > { %v528_v31 = vadd.f32 %v521_v23, %v516_v27  ;;  %v534_v32 = vmax.f32 %v530_v28, 0.0 }
 0x148   : > { %v531_v33 = vmax.f32 %v527_v29, 0.0  ;;  %537 = vst [vmem:[%s379_s28 + $0x10] sm:$0xff] %v533_v30 }
 0x149   : > { %v532_v34 = vmax.f32 %v528_v31, 0.0  ;;  %538 = vst [vmem:[%s379_s28 + $0x18] sm:$0xff] %v534_v32 }
 0x14a   : > { %535 = vst [vmem:[%s379_s28] sm:$0xff] %v531_v33 }
 0x14b   : > { %536 = vst [vmem:[%s379_s28 + $0x8] sm:$0xff] %v532_v34 }
 0x14c   : > { %976 = shalt.err (!%p973_p10)
}
 0x14d   : > { %s977_s10 = scalar_lea.hbm %s1354_s20, 512  ;;  %s981_s27 = scalar_lea.hbm %s1401_s5, 2048 }
 0x14e   : > { %p978_p4 = scmp.ne.s32.totalorder %s1354_s20, %s977_s10  ;;  %p982_p1 = scmp.lt.s32.totalorder %s1354_s20, %s1401_s5 }
 0x14f   : > { %p983_p8 = scmp.lt.s32.totalorder %s981_s27, %s977_s10 }
 0x150   : > { %p979_p5 = pnand %p978_p4, %p1431_p0 }
 0x151   : > { %p984_p12 = por %p983_p8, %p982_p1 }
 0x152   : > { %p980_p7 = pneg %p979_p5 }
 0x154   : > { %p985_p9 = pnand %p984_p12, %p980_p7 }
 0x156   : > { %988 = shalt.err (!%p985_p9)
}
 0x157   : > { %s1051_s14 = smov 256   ;;  %s1052_s26 = smov 16  }
 0x158   : > { %760 = dma.vmem_to_hbm [thread:$0]  (%p1431_p0), %s1349_s15, 512, %s1354_s20, %s540_s22, %s1051_s14, %s1051_s14, %s1052_s26  }
 0x159 PF: > { %s1432_s13 = sld [smem:[#allocation18_spill]]  ;;  %p780_p2 = scmp.ge.s32.totalorder %s1035_s21, 2 }
 0x15a   : > { %s569_s16 = sand.u32 1, %s1023_s18  }
 0x15b   : > { %s570_s12 = scalar_lea.sflag [#allocation4], %s569_s16 }
 0x15f   : > { %p1433_p11 = scmp.ne.s32.totalorder %s1432_s13, 0 }
 0x161   : > { %p776_p6 = pnand %p780_p2, %p1433_p11 }
 0x163   : > { %p777_p13 = pneg %p776_p6 }
 0x165   : > { %1018 = dma.done.wait (%p777_p13), %s570_s12, 512  }
 0x166   : > { %1020 = vsyncadd (%p777_p13), %s570_s12, 4294966784  ;;  %s1434_s21 = sld [smem:[#allocation16_spill]]  ;;  %s1437_s18 = smov %s1027_s19 }
 0x167   : > { %s1435_s28 = sld [smem:[#allocation15_spill]] }
 0x168   : > { %s1436_s20 = sld [smem:[#allocation17_spill]] }
 0x16c   : > { %p24_p3 = scmp.ge.s32.totalorder %s1434_s21, 6  }
 0x16d   : > { %s1438_s19 = smov %s1435_s28 }
 0x16e   :  { %26 = sbr.rel (!%p24_p3) target bundleno = 12 (0xc), region = 125 }
 0x173   :  { %575 = vsyncpa [#allocation3], 1 }
 0x174   :  { %577 = vsyncpa [#allocation3 + $0x1], 1 }
 0x175   :  { %578 = vsyncpa [#allocation6], 1 }
 0x176   :  { %580 = vsyncpa [#allocation6 + $0x1], 1 }
 0x177   :  { %581 = vsyncpa [#allocation9], 1 }
 0x178   :  { %583 = vsyncpa [#allocation9 + $0x1], 1 }
 0x179   :  { %584 = vsyncpa [#allocation4], 1 }
 0x17a   :  { %586 = vsyncpa [#allocation4 + $0x1], 1 }

</bundles_post_ra>
